<compile_context>
chip_gen: v5e
topology: v5e:2x2
jax: 0.10.0
libtpu: 0.0.40
codegen_flags: <defaults>
</compile_context>

<pallas_src>
import jax
import jax.numpy as jnp
from jax.experimental import pallas as pl
from jax.experimental.pallas import tpu as pltpu


def _round_up(a, m):
    return (a + m - 1) // m * m


def _scn_linear_kernel(beta_ref, x_ref, w_ref, o_ref, acc_ref):
    # beta_ref: SMEM (d,)            -- mixing coefficients (scalar prefetch)
    # x_ref   : VMEM (tb, K)         -- batch tile of [x | 1] (bias column folded in)
    # w_ref   : VMEM (1, K, to)      -- copy-k slice of the stacked [W^T ; b] params
    # o_ref   : VMEM (tb, to)        -- output tile
    # acc_ref : VMEM (tb, to) f32    -- accumulator across the d reduction axis
    k = pl.program_id(2)

    @pl.when(k == 0)
    def _init():
        acc_ref[...] = jnp.zeros_like(acc_ref)

    # sum_k beta_k * (x @ W_k): scale the small x tile (cheap VPU work) and let
    # the MXU + f32 accumulator perform the d-reduction.
    xk = x_ref[...] * beta_ref[k]
    acc_ref[...] += jnp.dot(xk, w_ref[0], preferred_element_type=jnp.float32)

    @pl.when(k == pl.num_programs(2) - 1)
    def _finalize():
        o_ref[...] = acc_ref[...].astype(o_ref.dtype)


def scn_linear_forward(beta, weight_stack, bias_stack, x, *, tb=None, to=None):
    """SCN configuration(beta) + Linear forward.

    beta: (d,), weight_stack: (d, OUT, IN), bias_stack: (d, OUT) or None,
    x: (B, IN).  Returns (B, OUT) float32.
    """
    d, out_f, in_f = weight_stack.shape
    B = x.shape[0]

    beta = beta.astype(jnp.float32)
    x = x.astype(jnp.float32)

    # Canonical layout (d, K, OUT); fold bias in as one extra contraction row.
    w_t = jnp.transpose(weight_stack, (0, 2, 1)).astype(jnp.float32)  # (d, IN, OUT)
    if bias_stack is not None:
        w_aug = jnp.concatenate(
            [w_t, bias_stack.astype(jnp.float32)[:, None, :]], axis=1)  # (d, IN+1, OUT)
        x_aug = jnp.concatenate([x, jnp.ones((B, 1), jnp.float32)], axis=1)
    else:
        w_aug, x_aug = w_t, x
    K = w_aug.shape[1]

    # Padded / tiled shapes: lane axis (OUT) to multiples of 128, sublane-ish
    # axes (B, K) to multiples of 8.
    K_p = _round_up(K, 8)
    OUT_p = _round_up(out_f, 128)
    if to is None:
        to = 256 if OUT_p % 256 == 0 else 128
    if tb is None:
        tb = min(_round_up(B, 8), 128)
    B_p = _round_up(B, tb)

    x_pad = jnp.pad(x_aug, ((0, B_p - B), (0, K_p - K)))
    w_pad = jnp.pad(w_aug, ((0, 0), (0, K_p - K), (0, OUT_p - out_f)))

    grid = (B_p // tb, OUT_p // to, d)

    out = pl.pallas_call(
        _scn_linear_kernel,
        out_shape=jax.ShapeDtypeStruct((B_p, OUT_p), jnp.float32),
        grid_spec=pltpu.PrefetchScalarGridSpec(
            num_scalar_prefetch=1,                      # beta -> SMEM
            grid=grid,
            in_specs=[
                # x tile: constant across (j, k) -> DMA'd once per batch tile.
                pl.BlockSpec((tb, K_p), lambda i, j, k, beta_s: (i, 0)),
                # weight tile of copy k, OUT-tile j: streams through VMEM.
                pl.BlockSpec((1, K_p, to), lambda i, j, k, beta_s: (k, 0, j)),
            ],
            out_specs=pl.BlockSpec((tb, to), lambda i, j, k, beta_s: (i, j)),
            scratch_shapes=[pltpu.VMEM((tb, to), jnp.float32)],
        ),
        compiler_params=pltpu.CompilerParams(
            dimension_semantics=("parallel", "parallel", "arbitrary")),
    )(beta, x_pad, w_pad)

    return out[:B, :out_f]


if __name__ == "__main__":
    key = jax.random.PRNGKey(0)
    k_w, k_b, k_x, k_beta = jax.random.split(key, 4)

    d = 4            # number of parameter copies in the SCN layer
    in_features = 40
    out_features = 48
    batch = 6        # exercises B / OUT / K padding paths

    # Deterministic "original layer" parameters; per-copy perturbation so the
    # beta mixing is actually exercised numerically.
    w0 = jax.random.normal(k_w, (out_features, in_features), jnp.float32) * 0.1
    b0 = jax.random.normal(k_b, (out_features,), jnp.float32) * 0.1
    copy_scale = 1.0 + 0.05 * jnp.arange(d, dtype=jnp.float32)
    weight_stack = w0[None, :, :] * copy_scale[:, None, None]   # (d, OUT, IN)
    bias_stack = b0[None, :] * copy_scale[:, None]              # (d, OUT)

    beta = jax.random.normal(k_beta, (d,), jnp.float32)
    x = jax.random.normal(k_x, (batch, in_features), jnp.float32)

    out = scn_linear_forward(beta, weight_stack, bias_stack, x)
    out = jax.block_until_ready(out)

    # Pure-JAX reference: configuration(beta) then Linear forward.
    w_c = jnp.einsum("k,koi->oi", beta, weight_stack)
    b_c = jnp.einsum("k,ko->o", beta, bias_stack)
    ref = x @ w_c.T + b_c

    assert out.shape == (batch, out_features)
    assert jnp.allclose(out, ref, atol=1e-5, rtol=1e-5), "mismatch vs reference"
    print("KERNEL_OK")
</pallas_src>

<mosaic_0001>
module attributes {stable_mosaic.version = 11 : i64} {
  func.func @_scn_linear_kernel(%arg0: i32, %arg1: i32, %arg2: i32, %arg3: memref<4xf32, #tpu.memory_space<smem>>, %arg4: memref<8x48xf32, #tpu.memory_space<vmem>>, %arg5: memref<1x48x128xf32, #tpu.memory_space<vmem>>, %arg6: memref<8x128xf32, #tpu.memory_space<vmem>>, %arg7: memref<8x128xf32, #tpu.memory_space<vmem>>) attributes {dimension_semantics = [#tpu.dimension_semantics<parallel>, #tpu.dimension_semantics<parallel>, #tpu.dimension_semantics<arbitrary>], iteration_bounds = array<i64: 1, 1, 4>, scalar_prefetch = 1 : i64, scratch_operands = 1 : i64, tpu.core_type = #tpu.core_type<tc>, window_params = [{transform_indices = @transform_0, window_bounds = array<i64: 8, 48>}, {transform_indices = @transform_1, window_bounds = array<i64: 1, 48, 128>}, {transform_indices = @transform_2, window_bounds = array<i64: 8, 128>}]} {
    %c0_i32 = arith.constant 0 : i32
    %0 = arith.cmpi eq, %arg2, %c0_i32 : i32
    %1 = arith.extui %0 : i1 to i32
    %c0_i32_0 = arith.constant 0 : i32
    %2 = arith.cmpi ne, %1, %c0_i32_0 : i32
    scf.if %2 {
      %cst_10 = arith.constant 0.000000e+00 : f32
      %17 = vector.broadcast %cst_10 : f32 to vector<8x128xf32>
      %c0_11 = arith.constant 0 : index
      %c0_12 = arith.constant 0 : index
      %18 = vector.load %arg7[%c0_11, %c0_12] : memref<8x128xf32, #tpu.memory_space<vmem>>, vector<8x128xf32>
      tpu.vector_store %arg7[%c0_11, %c0_12], %17 {strides = array<i32>} : memref<8x128xf32, #tpu.memory_space<vmem>>, vector<8x128xf32>,
    } else {
    }
    %c0 = arith.constant 0 : index
    %c0_1 = arith.constant 0 : index
    %3 = vector.load %arg4[%c0, %c0_1] : memref<8x48xf32, #tpu.memory_space<vmem>>, vector<8x48xf32>
    %4 = arith.index_cast %arg2 : i32 to index
    %5 = memref.load %arg3[%4] : memref<4xf32, #tpu.memory_space<smem>>
    %6 = vector.broadcast %5 : f32 to vector<8x48xf32>
    %7 = arith.mulf %3, %6 : vector<8x48xf32>
    %c0_2 = arith.constant 0 : index
    %c0_3 = arith.constant 0 : index
    %8 = vector.load %arg7[%c0_2, %c0_3] : memref<8x128xf32, #tpu.memory_space<vmem>>, vector<8x128xf32>
    %c0_4 = arith.constant 0 : index
    %c0_5 = arith.constant 0 : index
    %c0_6 = arith.constant 0 : index
    %9 = vector.load %arg5[%c0_4, %c0_5, %c0_6] : memref<1x48x128xf32, #tpu.memory_space<vmem>>, vector<1x48x128xf32>
    %10 = vector.shape_cast %9 : vector<1x48x128xf32> to vector<48x128xf32>
    %cst = arith.constant dense<0.000000e+00> : vector<8x128xf32>
    %11 = tpu.matmul %7, %10, %cst {dimension_numbers = #tpu.dot_dimension_numbers<[1], [0], [0], [1], [0, 0, 1, 1], [], []>} : vector<8x48xf32>, vector<48x128xf32>, vector<8x128xf32> -> vector<8x128xf32>
    %12 = arith.addf %8, %11 : vector<8x128xf32>
    %c0_7 = arith.constant 0 : index
    %c0_8 = arith.constant 0 : index
    %13 = vector.load %arg7[%c0_7, %c0_8] : memref<8x128xf32, #tpu.memory_space<vmem>>, vector<8x128xf32>
    tpu.vector_store %arg7[%c0_7, %c0_8], %12 {strides = array<i32>} : memref<8x128xf32, #tpu.memory_space<vmem>>, vector<8x128xf32>,
    %c3_i32 = arith.constant 3 : i32
    %14 = arith.cmpi eq, %arg2, %c3_i32 : i32
    %15 = arith.extui %14 : i1 to i32
    %c0_i32_9 = arith.constant 0 : i32
    %16 = arith.cmpi ne, %15, %c0_i32_9 : i32
    scf.if %16 {
      %c0_10 = arith.constant 0 : index
      %c0_11 = arith.constant 0 : index
      %17 = vector.load %arg7[%c0_10, %c0_11] : memref<8x128xf32, #tpu.memory_space<vmem>>, vector<8x128xf32>
      %c0_12 = arith.constant 0 : index
      %c0_13 = arith.constant 0 : index
      %18 = vector.load %arg6[%c0_12, %c0_13] : memref<8x128xf32, #tpu.memory_space<vmem>>, vector<8x128xf32>
      tpu.vector_store %arg6[%c0_12, %c0_13], %17 {strides = array<i32>} : memref<8x128xf32, #tpu.memory_space<vmem>>, vector<8x128xf32>,
    } else {
    }
    return
  }
  func.func @transform_0(%arg0: i32, %arg1: i32, %arg2: i32, %arg3: memref<4xf32, #tpu.memory_space<smem>>) -> (i32, i32) {
    %c0_i32 = arith.constant 0 : i32
    %c0_i32_0 = arith.constant 0 : i32
    return %arg0, %c0_i32 : i32, i32
  }
  func.func @transform_1(%arg0: i32, %arg1: i32, %arg2: i32, %arg3: memref<4xf32, #tpu.memory_space<smem>>) -> (i32, i32, i32) {
    %c0_i32 = arith.constant 0 : i32
    %c0_i32_0 = arith.constant 0 : i32
    return %arg2, %c0_i32, %arg1 : i32, i32, i32
  }
  func.func @transform_2(%arg0: i32, %arg1: i32, %arg2: i32, %arg3: memref<4xf32, #tpu.memory_space<smem>>) -> (i32, i32) {
    %c0_i32 = arith.constant 0 : i32
    return %arg0, %arg1 : i32, i32
  }
}

</mosaic_0001>

<bundles_post_ra>
// kernel: tpu_custom_call.1
= control target key start
LH: loop header
LB: loop body
LE: loop exit
PB: predicated region body
PF: predicated region fallthrough
CT: control target
= control target key end

     0   :  { %s609_s15 = smov [#allocation4]   ;;  %s762_s0 = inlined_call_operand.hbm [shape: f32[4], index: 0, kind: input, shape index: {}]   ;;  %s763_s1 = inlined_call_operand.hbm [shape: f32[8,48], index: 1, kind: input, shape index: {}]   ;;  %s764_s2 = inlined_call_operand.hbm [shape: f32[4,48,128], index: 2, kind: input, shape index: {}]   ;;  %s765_s3 = inlined_call_operand.hbm [shape: f32[8,128], index: 3, kind: output, shape index: {}]  }
   0x1   :  { %s9_s14 = sshll.u32 %s762_s0, 4  ;;  %s10_s14 = int_to_ptr.hbm [resolvable:$true] %s9_s14 }
   0x2   :  { %12 = dma.hbm_to_smem %s10_s14, 16, %s609_s15, [#allocation3] }
   0x3   :  { %571 = dma.done.wait [#allocation3], 16 }
   0x4   :  { %572 = vsyncadd [#allocation3], 4294967280 }
   0x5   :  { %15 = sfence }
   0x6   :  { %16 = vsyncpa [#allocation6], 0 }
   0x7   :  { %17 = vsyncpa [#allocation9], 0 }
   0x8   :  { %19 = vsyncpa [#allocation9 + $0x1], 0 }
   0x9   :  { %20 = vsyncpa [#allocation7], 0  ;;  %s638_s16 = smov 0   ;;  %s640_s17 = smov 0  }
   0xa   :  { %s642_s18 = smov 0   ;;  %s644_s19 = smov 0  }
   0xb   :  { %s646_s20 = smov 0   ;;  %s648_s0 = smov 0  }
   0xc LB: > { %s353_s21 = sadd.s32 4294967295, %s607_s0   ;;  %s80_s22 = sadd.s32 1, %s595_s18  ;;  %s607_s0 = sphi %s648_s0, %s26_s0   ;;  %s603_s20 = sphi %s646_s20, %s775_s20   ;;  %s599_s19 = sphi %s644_s19, %s774_s19   ;;  %s595_s18 = sphi %s642_s18, %s773_s18   ;;  %s591_s17 = sphi %s640_s17, %s772_s17   ;;  %s587_s16 = sphi %s638_s16, %s771_s16  }
   0xd   : > { %p87_p0 = scmp.ne.s32.totalorder %s595_s18, %s591_s17  ;;  %p88_p1 = scmp.eq.s32.totalorder %s607_s0, 0 }
   0xe   : > { %p93_p2 = scmp.ne.s32.totalorder %s591_s17, %s587_s16  ;;  %p674_p3 = scmp.eq.s32.totalorder %s353_s21, 0 }
   0xf   : > { %p678_p4 = por %p88_p1, %p87_p0  ;;  %p354_p5 = scmp.ge.s32.totalorder %s607_s0, 1 }
  0x10   : > { %p685_p6 = por %p674_p3, %p93_p2  ;;  %p132_p7 = scmp.lt.s32.totalorder %s607_s0, 5 }
  0x11   : > { %s146_s28 = sshll.u32 %s763_s1, 4  ;;  %s610_s30 = smov [#allocation5]   ;;  %s147_s28 = int_to_ptr.hbm [resolvable:$true] %s146_s28 }
  0x12   : > { %p693_p8 = pnand %p354_p5, %p132_p7  ;;  %s148_s4 = sshll.u32 %s610_s30, 4  ;;  %s149_s4 = int_to_ptr.vmem [resolvable:$true] %s148_s4 }
  0x13   : > { %p389_p10 = scmp.lt.s32.totalorder %s607_s0, 4  ;;  %s38_s6 = sadd.s32 1, %s603_s20 }
  0x14   : > { %p380_p9 = pneg %p693_p8  ;;  %p39_p13 = scmp.ge.s32.totalorder %s38_s6, 4 }
  0x15   : > { %p704_p12 = pnand %p389_p10, %p678_p4  ;;  %s159_s7 = sand.u32 1, %s595_s18  }
  0x16   : > { %p381_p11 = pnand %p380_p9, %p674_p3  ;;  %s368_s8 = smul.u32 48, %s603_s20 }
  0x17   : > { %s777_s6 = smov (%p39_p13, %s38_s6), 0  ;;  %s367_s9 = smul.u32 48, %s159_s7 }
  0x18   : > { %383 = dma.hbm_to_vmem [thread:$0]  (!%p381_p11), %s147_s28, 128, %s149_s4, [#allocation6]  }
  0x19   : > { %s75_s10 = ssub.s32 %s603_s20, %s777_s6  ;;  %s169_s13 = scalar_lea.hbm %s764_s2, %s368_s8 }
  0x1a   : > { %p78_p0 = scmp.eq.s32.totalorder %s75_s10, 0  ;;  %s170_s14 = sshll.u32 %s169_s13, 4  ;;  %s171_s14 = int_to_ptr.hbm [resolvable:$true] %s170_s14 }
  0x1b   : > { %s163_s15 = scalar_lea.vmem [#allocation8], %s367_s9  ;;  %s160_s26 = scalar_lea.sflag [#allocation9], %s159_s7 }
  0x1c   : > { %s172_s16 = sshll.u32 %s163_s15, 4  ;;  %s611_s27 = smov 128   ;;  %s173_s16 = int_to_ptr.vmem [resolvable:$true] %s172_s16 }
  0x1d   : > { %s721_s24 = scalar_select %p78_p0, %s595_s18, %s80_s22  }
  0x1e   : > { %s612_s28 = smov 8   ;;  %184 = sbr.rel (%p693_p8) target bundleno = 205 (0xcd), region = 28 }
  0x1f   : > { %387 = dma.hbm_to_vmem [thread:$0]  (!%p704_p12), %s171_s14, 768, %s173_s16, %s160_s26, %s611_s27, %s611_s27, %s612_s28  }
  0x23   : > { %574 = dma.done.wait (%p674_p3), [#allocation6], 128  }
  0x24   : > { %576 = vsyncadd (%p674_p3), [#allocation6], 4294967168  ;;  %s191_s22 = sand.u32 1, %s591_s17  }
  0x25   : > { %s369_s30 = smul.u32 48, %s191_s22  ;;  %s192_s4 = scalar_lea.sflag [#allocation9], %s191_s22 }
  0x27   : > { %s195_s8 = scalar_lea.vmem [#allocation8], %s369_s30 }
  0x28   : > { %578 = dma.done.wait (%p685_p6), %s192_s4, 768  }
  0x29   : > { %580 = vsyncadd (%p685_p6), %s192_s4, 4294966528  ;;  %p360_p1 = scmp.ne.s32.totalorder %s599_s19, 0 }
  0x2b   : > { %215 = sbr.rel (%p360_p1) target bundleno = 50 (0x32), region = 40 }
  0x30   : > { %v613_v0 = vmov 0.0  }
  0x31   : > { %216 = vst [vmem:[#allocation2] sm:$0xff] %v613_v0 }
  0x32 PF: > { %v227_v1 = vld [vmem:[%s195_s8 + $0x28] sm:$0xff]  ;;  %v226_v2 = vld [vmem:[%s195_s8 + $0x20] sm:$0xff]  ;;  %s218_s23 = sld [smem:[#allocation4 + %s599_s19]]  ;;  %v225_v3 = vld [vmem:[%s195_s8 + $0x18] sm:$0xff]  ;;  %vm228_vm0 = vcmask 392192   ;;  %p362_p2 = scmp.ne.s32.totalorder %s599_s19, 3 }
  0x33   : > { %242 = vmatpush.msra.mxu0 %v227_v1  ;;  %v224_v4 = vld [vmem:[%s195_s8 + $0x10] sm:$0xff]  ;;  %v217_v5 = vld [vmem:[#allocation5] sm:$0xff]  ;;  %v222_v8 = vld [vmem:[%s195_s8] sm:$0xff] }
  0x34   : > { %v223_v6 = vld [vmem:[%s195_s8 + $0x8] sm:$0xff] }
  0x35   : > { %243 = vmatpush.msra.mxu0 %v226_v2 }
  0x37   : > { %244 = vmatpush.msra.mxu0 %v225_v3 }
  0x38   : > { %v219_v7 = vstv %s218_s23  ;;  %v221_v10 = vld [vmem:[#allocation2] sm:$0xff] }
  0x39   : > { %245 = vmatpush.msra.mxu0 %v224_v4  ;;  %v220_v9 = vmul.f32 %v219_v7, %v217_v5 }
  0x3b   : > { %246 = vmatpush.msra.mxu0 %v223_v6 }
  0x3d   : > { %247 = vmatpush.msra.mxu0 %v222_v8 }
  0x3e   : > { %361 = vmatmul.msk.f32.vlgmr.msra.gmra.mxu0 %vm228_vm0, %v220_v9 }
  0xba   : > { %257 = sbr.rel (%p362_p2) target bundleno = 199 (0xc7), region = 44 }
  0xbb   : > { %v249_v11 = vpop.f32.mrf.mxu0 }
  0xbc   : > { %v252_v12 = vadd.f32 %v249_v11, %v221_v10 }
  0xbe   : > { %253 = vst [vmem:[#allocation2] sm:$0xff] %v252_v12 }
  0xc5   : > { %v258_v13 = vld [vmem:[#allocation2] sm:$0xff] }
  0xc6   : > { %259 = vst [vmem:[#allocation10] sm:$0xff] %v258_v13 }
  0xc7 PF: > { %p391_p3 = scmp.eq.s32.totalorder %s353_s21, 3  ;;  %s271_s5 = sshll.u32 %s765_s3, 4  ;;  %s272_s5 = int_to_ptr.hbm [resolvable:$true] %s271_s5 }
  0xc8   : > { %s614_s7 = smov [#allocation10]  }
  0xc9   : > { %s269_s9 = sshll.u32 %s614_s7, 4  ;;  %s270_s9 = int_to_ptr.vmem [resolvable:$true] %s269_s9 }
  0xca   : > { %377 = dma.vmem_to_hbm [thread:$0]  (%p391_p3), %s270_s9, 128, %s272_s5, [#allocation7]  }
  0xcb   : > { %582 = dma.done.wait (%p391_p3), [#allocation7], 128  }
  0xcc   : > { %584 = vsyncadd (%p391_p3), [#allocation7], 4294967168 }
  0xcd PF: > { %s26_s0 = sadd.s32 1, %s607_s0   ;;  %s771_s16 = smov %s591_s17 }
  0xce   : > { %p23_p4 = scmp.ge.s32.totalorder %s26_s0, 6   ;;  %s772_s17 = smov %s595_s18 }
  0xcf   : > { %s773_s18 = smov %s721_s24  ;;  %s774_s19 = smov %s603_s20 }
  0xd0   : > { %s775_s20 = smov %s777_s6  ;;  %25 = sbr.rel (!%p23_p4) target bundleno = 12 (0xc), region = 80 }
  0xd5   :  { %285 = vsyncpa [#allocation6], 1 }
  0xd6   :  { %287 = vsyncpa [#allocation6 + $0x1], 1 }
  0xd7   :  { %288 = vsyncpa [#allocation9], 1 }
  0xd8   :  { %290 = vsyncpa [#allocation9 + $0x1], 1 }
  0xd9   :  { %291 = vsyncpa [#allocation7], 1 }
  0xda   :  { %293 = vsyncpa [#allocation7 + $0x1], 1 }

</bundles_post_ra>
